<compile_context>
chip_gen: v5e
topology: v5e:2x2
jax: 0.10.0
libtpu: 0.0.40
codegen_flags: <defaults>
</compile_context>

<pallas_src>
import jax
import jax.numpy as jnp
import numpy as np
from jax.experimental import pallas as pl
from jax.experimental.pallas import tpu as pltpu


def _gelu_kernel(x_ref, o_ref):
    x = x_ref[...].astype(jnp.float32)
    # x * sigmoid(1.702 * x) == x / (1 + exp(-1.702 * x))
    y = x / (1.0 + jnp.exp(-1.702 * x))
    o_ref[...] = y.astype(o_ref.dtype)


def gelu(x, *, block_rows=512):
    """Sigmoid-approximate GELU, any shape / floating dtype."""
    orig_shape = x.shape
    n = int(np.prod(orig_shape)) if len(orig_shape) else 1
    if n == 0:
        return x

    flat = x.reshape(-1)

    # Pick a lane width (multiple of 128) that divides n if possible, so the
    # common aligned case needs no padding copy.  Fall back to 1024 + pad.
    lanes = None
    for cand in (1024, 512, 256, 128):
        if n % cand == 0:
            lanes = cand
            break
    if lanes is None:
        lanes = 1024

    rows = pl.cdiv(n, lanes)
    if rows <= block_rows:
        br = rows                      # single block == full row extent
        rows_p = rows
    else:
        br = block_rows
        rows_p = pl.cdiv(rows, block_rows) * block_rows

    padded = rows_p * lanes
    if padded != n:
        flat = jnp.pad(flat, (0, padded - n))
    x2d = flat.reshape(rows_p, lanes)

    grid = (rows_p // br,)
    itemsize = jnp.dtype(x.dtype).itemsize
    out2d = pl.pallas_call(
        _gelu_kernel,
        out_shape=jax.ShapeDtypeStruct((rows_p, lanes), x.dtype),
        grid=grid,
        in_specs=[pl.BlockSpec((br, lanes), lambda i: (i, 0))],
        out_specs=pl.BlockSpec((br, lanes), lambda i: (i, 0)),
        compiler_params=pltpu.CompilerParams(
            dimension_semantics=("parallel",)),
        cost_estimate=pl.CostEstimate(
            flops=4 * padded,
            transcendentals=padded,
            bytes_accessed=2 * padded * itemsize),
    )(x2d)

    out_flat = out2d.reshape(-1)
    if padded != n:
        out_flat = out_flat[:n]
    return out_flat.reshape(orig_shape)


def _reference(x):
    x = np.asarray(x, np.float64)
    return x / (1.0 + np.exp(-1.702 * x))


if __name__ == "__main__":
    key = jax.random.PRNGKey(0)
    k0, k1 = jax.random.split(key)

    # Small deterministic input consistent with the module's elementwise forward.
    x = jax.random.normal(k0, (2, 4, 16, 16), jnp.float32)
    out = jax.block_until_ready(gelu(x))
    assert out.shape == x.shape and out.dtype == x.dtype
    assert np.allclose(np.asarray(out), _reference(x), rtol=1e-5, atol=1e-5)

    # Odd (non-tile-aligned) shape exercises the padding path.
    x_odd = jax.random.normal(k1, (3, 5, 7), jnp.float32)
    out_odd = jax.block_until_ready(gelu(x_odd))
    assert out_odd.shape == x_odd.shape
    assert np.allclose(np.asarray(out_odd), _reference(x_odd),
                       rtol=1e-5, atol=1e-5)

    print("KERNEL_OK")
</pallas_src>

<mosaic_0001>
module attributes {stable_mosaic.version = 11 : i64} {
  func.func @_gelu_kernel(%arg0: i32, %arg1: memref<2x1024xf32, #tpu.memory_space<vmem>>, %arg2: memref<2x1024xf32, #tpu.memory_space<vmem>>) attributes {dimension_semantics = [#tpu.dimension_semantics<parallel>], iteration_bounds = array<i64: 1>, scalar_prefetch = 0 : i64, scratch_operands = 0 : i64, tpu.core_type = #tpu.core_type<tc>, window_params = [{transform_indices = @transform_0, window_bounds = array<i64: 2, 1024>}, {transform_indices = @transform_1, window_bounds = array<i64: 2, 1024>}]} {
    %c0 = arith.constant 0 : index
    %c0_0 = arith.constant 0 : index
    %0 = vector.load %arg1[%c0, %c0_0] : memref<2x1024xf32, #tpu.memory_space<vmem>>, vector<2x1024xf32>
    %cst = arith.constant -1.702000e+00 : f32
    %1 = vector.broadcast %cst : f32 to vector<2x1024xf32>
    %2 = arith.mulf %1, %0 : vector<2x1024xf32>
    %3 = math.exp %2 : vector<2x1024xf32>
    %cst_1 = arith.constant 1.000000e+00 : f32
    %4 = vector.broadcast %cst_1 : f32 to vector<2x1024xf32>
    %5 = arith.addf %4, %3 : vector<2x1024xf32>
    %6 = arith.divf %0, %5 : vector<2x1024xf32>
    %c0_2 = arith.constant 0 : index
    %c0_3 = arith.constant 0 : index
    %7 = vector.load %arg2[%c0_2, %c0_3] : memref<2x1024xf32, #tpu.memory_space<vmem>>, vector<2x1024xf32>
    tpu.vector_store %arg2[%c0_2, %c0_3], %6 {strides = array<i32>} : memref<2x1024xf32, #tpu.memory_space<vmem>>, vector<2x1024xf32>,
    return
  }
  func.func @transform_0(%arg0: i32) -> (i32, i32) {
    %c0_i32 = arith.constant 0 : i32
    %c0_i32_0 = arith.constant 0 : i32
    return %arg0, %c0_i32 : i32, i32
  }
  func.func @transform_1(%arg0: i32) -> (i32, i32) {
    %c0_i32 = arith.constant 0 : i32
    %c0_i32_0 = arith.constant 0 : i32
    return %arg0, %c0_i32 : i32, i32
  }
}

</mosaic_0001>

<bundles_post_ra>
// kernel: tpu_custom_call.1
= control target key start
LH: loop header
LB: loop body
LE: loop exit
PB: predicated region body
PF: predicated region fallthrough
CT: control target
= control target key end

     0   :  { %6 = vsyncpa [#allocation3], 0  ;;  %s162_s0 = inlined_call_operand.hbm [shape: f32[2,1024], index: 0, kind: input, shape index: {}]   ;;  %s163_s1 = inlined_call_operand.hbm [shape: f32[2,1024], index: 1, kind: output, shape index: {}]  }
   0x1   :  { %7 = vsyncpa [#allocation4], 0  ;;  %s13_s8 = sshll.u32 %s162_s0, 4  ;;  %s144_s9 = smov [#allocation2]   ;;  %s14_s8 = int_to_ptr.hbm [resolvable:$true] %s13_s8 }
   0x2   :  { %s15_s10 = sshll.u32 %s144_s9, 4  ;;  %s16_s10 = int_to_ptr.vmem [resolvable:$true] %s15_s10 }
   0x3   :  { %18 = dma.hbm_to_vmem [thread:$0]  %s14_s8, 256, %s16_s10, [#allocation3]  }
   0x4   :  { %140 = dma.done.wait [#allocation3], 256  }
   0x5   :  { %141 = vsyncadd [#allocation3], 4294967040  ;;  %v23_v0 = vld [vmem:[#allocation2] sm:$0xff]  ;;  %v24_v1 = vld [vmem:[#allocation2 + $0x8] sm:$0xff]  ;;  %s145_s0 = smov [#allocation5]   ;;  %s72_s14 = sshll.u32 %s163_s1, 4  ;;  %s73_s14 = int_to_ptr.hbm [resolvable:$true] %s72_s14 }
   0x6   :  { %v25_v2 = vmul.f32 -1.702, %v23_v0  ;;  %v26_v3 = vmul.f32 -1.702, %v24_v1  ;;  %s70_s11 = sshll.u32 %s145_s0, 4  ;;  %s71_s11 = int_to_ptr.vmem [resolvable:$true] %s70_s11 }
   0x8   :  { %v27_v4 = vmul.f32 1.442695, %v25_v2  ;;  %v29_v5 = vmul.f32 1.442695, %v26_v3 }
   0xa   :  { %84 = vpow2.f32 %v27_v4 }
   0xb   :  { %86 = vpow2.f32 %v29_v5 }
  0x10   :  { %v85_v6 = vpop.eup %84 }
  0x11   :  { %v87_v7 = vpop.eup %86  ;;  %v31_v8 = vadd.f32 1.0, %v85_v6 }
  0x12   :  { %v32_v9 = vadd.f32 1.0, %v87_v7 }
  0x13   :  { %88 = vrcp.f32 %v31_v8  ;;  %vm38_vm0 = vweird.f32 %v31_v8  ;;  %v44_v13 = vand.u32 2147483648, %v31_v8  ;;  %v42_v16 = vand.u32 2147483647, %v31_v8 }
  0x14   :  { %90 = vrcp.f32 %v32_v9  ;;  %v59_v17 = vand.u32 2147483648, %v32_v9  ;;  %vm53_vm2 = vweird.f32 %v32_v9  ;;  %v57_v19 = vand.u32 2147483647, %v32_v9 }
  0x15   :  { %v45_v21 = vor.u32 1.1754944e-38, %v44_v13  ;;  %vm43_vm5 = vcmp.eq.f32.partialorder %v42_v16, 8.507059e+37 }
  0x16   :  { %v60_v24 = vor.u32 1.1754944e-38, %v59_v17  ;;  %vm58_vm7 = vcmp.eq.f32.partialorder %v57_v19, 8.507059e+37 }
  0x19   :  { %v89_v10 = vpop.eup %88 }
  0x1a   :  { %v91_v11 = vpop.eup %90  ;;  %v34_v12 = vmul.f32 %v89_v10, %v31_v8  ;;  %vm39_vm1 = vweird.f32 %v89_v10 }
  0x1b   :  { %v49_v14 = vmul.f32 %v91_v11, %v32_v9  ;;  %vm54_vm3 = vweird.f32 %v91_v11  ;;  %vm40_vm4 = vmor %vm38_vm0, %vm39_vm1 }
  0x1c   :  { %v35_v15 = vsub.f32 1.0, %v34_v12  ;;  %vm55_vm6 = vmor %vm53_vm2, %vm54_vm3 }
  0x1d   :  { %v50_v18 = vsub.f32 1.0, %v49_v14 }
  0x1e   :  { %v36_v20 = vmul.f32 %v89_v10, %v35_v15 }
  0x1f   :  { %v51_v22 = vmul.f32 %v91_v11, %v50_v18 }
  0x20   :  { %v37_v23 = vadd.f32 %v89_v10, %v36_v20 }
  0x21   :  { %v52_v25 = vadd.f32 %v91_v11, %v51_v22 }
  0x22   :  { %v41_v26 = vsel %vm40_vm4, %v89_v10, %v37_v23 }
  0x23   :  { %v46_v27 = vsel %vm43_vm5, %v45_v21, %v41_v26  ;;  %v56_v28 = vsel %vm55_vm6, %v91_v11, %v52_v25 }
  0x24   :  { %v47_v29 = vmul.f32 %v46_v27, %v23_v0  ;;  %v61_v30 = vsel %vm58_vm7, %v60_v24, %v56_v28 }
  0x25   :  { %v62_v31 = vmul.f32 %v61_v30, %v24_v1 }
  0x26   :  { %63 = vst [vmem:[#allocation5] sm:$0xff] %v47_v29 }
  0x27   :  { %64 = vst [vmem:[#allocation5 + $0x8] sm:$0xff] %v62_v31 }
  0x28   :  { %75 = dma.vmem_to_hbm [thread:$0]  %s71_s11, 256, %s73_s14, [#allocation4]  }
  0x29   :  { %142 = dma.done.wait [#allocation4], 256  }
  0x2a   :  { %143 = vsyncadd [#allocation4], 4294967040 }
  0x2b   :  { %80 = vsyncpa [#allocation3], 1 }
  0x2c   :  { %81 = vsyncpa [#allocation4], 1 }

</bundles_post_ra>
